<compile_context>
chip_gen: v5e
topology: v5e:2x2
jax: 0.10.0
libtpu: 0.0.40
codegen_flags: <defaults>
</compile_context>

<pallas_src>
import functools

import jax
import jax.numpy as jnp
import numpy as np
from jax import lax
from jax.experimental import pallas as pl
from jax.experimental.pallas import tpu as pltpu


def _round_up(x, m):
    return (x + m - 1) // m * m


def _seq_ce_loss_kernel(mt_ref, logits_ref, targets_ref, lengths_ref, weights_ref,
                        out_ref, acc_ref, *, t_tile):
    """Grid = (batch_chunks ['parallel'], time_tiles ['arbitrary'])."""
    c = pl.program_id(0)
    t = pl.program_id(1)

    @pl.when(t == 0)
    def _():
        acc_ref[...] = jnp.zeros_like(acc_ref)

    # Skip time tiles that lie entirely beyond every sequence in this batch
    # chunk; the clamped index_map already re-uses the previous block for
    # them, so no DMA is issued either.
    @pl.when(t < mt_ref[c])
    def _():
        x = logits_ref[...]                              # (BB, Tt, C) native dtype
        tgt = targets_ref[...]                           # (BB, Tt, 1) int32
        lens = lengths_ref[...]                          # (BB, 1, 1)  int32 (clamped to T)

        BB, Tt, C = x.shape

        # Row max + one-hot target gather in the native dtype (exact: pure
        # select/compare); exp / log / accumulation in f32.
        m = jnp.max(x, axis=-1, keepdims=True)                                # (BB, Tt, 1)
        class_ids = lax.broadcasted_iota(jnp.int32, (1, 1, C), 2)             # lane iota only
        tgt_logit = jnp.sum(
            jnp.where(class_ids == tgt, x, jnp.zeros((), x.dtype)),
            axis=-1, keepdims=True).astype(jnp.float32)                       # (BB, Tt, 1)

        xf = x.astype(jnp.float32)
        mf = m.astype(jnp.float32)
        lse = mf + jnp.log(jnp.sum(jnp.exp(xf - mf), axis=-1, keepdims=True)) # (BB, Tt, 1)

        ce = lse - tgt_logit                                                  # (BB, Tt, 1)

        # Mask timesteps >= lengths[b].  This also neutralizes any ragged
        # boundary blocks of the (un-padded) logits whose VMEM contents are
        # unspecified, because padded samples have length 0.
        time_ids = t * t_tile + lax.broadcasted_iota(jnp.int32, (BB, Tt, 1), 1)
        ce = jnp.where(time_ids < lens, ce, 0.0)

        acc_ref[...] += jnp.sum(ce, axis=1, keepdims=True)                    # (BB, 1, 1)

    @pl.when(t == pl.num_programs(1) - 1)
    def _():
        # weights already hold 1/(length_i * batch_size) (0 for padded/empty
        # samples), so the epilogue is a multiply + sublane reduce only.
        w = weights_ref[...]                                                  # (BB, 1, 1) f32
        total = jnp.sum(acc_ref[...] * w, axis=0, keepdims=True)              # (1, 1, 1)
        out_ref[...] = jnp.zeros_like(out_ref) + total                        # splat to (1,8,128)


def seq_cross_entropy_loss(model_output, groundtruth, lengths,
                           *, target_tile_bytes=2 << 20):
    """model_output: [B, T, C] float (any float dtype), groundtruth: [B, T] int,
    lengths: [B] int. Returns the scalar loss of the PyTorch module."""
    B, T, C = model_output.shape
    dtype = model_output.dtype
    if not jnp.issubdtype(dtype, jnp.floating):
        model_output = model_output.astype(jnp.float32)
        dtype = model_output.dtype
    itemsize = jnp.dtype(dtype).itemsize

    # ---------------- tiling (sized against the lane-padded row width) -----
    Cp = _round_up(C, 128)                 # physical row width in VMEM (sizing only)
    row_bytes = Cp * itemsize
    if T * row_bytes <= target_tile_bytes:
        Tt = T                              # whole sequence in one time tile
    else:
        Tt = max(8, (target_tile_bytes // row_bytes) // 8 * 8)
        # TODO(synk): add a class-tile grid axis with an online logsumexp
        # accumulator for very large vocabularies (C >~ 100k) where even
        # Tt=8 rows exceed the VMEM budget.
    T_pad = _round_up(T, Tt)
    num_t = T_pad // Tt

    BB = int(max(1, target_tile_bytes // (Tt * row_bytes)))
    BB = min(BB, B)
    if B >= 2:
        # Keep at least 2 batch chunks so the "parallel" axis shards across
        # the two TensorCores on v7x (megacore).
        BB = min(BB, _round_up(B, 2) // 2)
    B_pad = _round_up(B, BB)
    num_chunks = B_pad // BB

    # ---------------- cheap host-side metadata (logits stay un-padded) -----
    lens = jnp.clip(lengths.astype(jnp.int32), 0, T)   # clamp like the torch slice [:L]
    # length==0 samples contribute 0 (PyTorch would NaN); padded samples get 0 too.
    w = jnp.where(lens > 0,
                  1.0 / (jnp.maximum(lens, 1).astype(jnp.float32) * B),
                  0.0)
    lens_flat = jnp.pad(lens, (0, B_pad - B))
    w_flat = jnp.pad(w, (0, B_pad - B)).astype(jnp.float32)
    lens_p = lens_flat.reshape(B_pad, 1, 1)
    w_p = w_flat.reshape(B_pad, 1, 1)

    targets_p = jnp.pad(groundtruth.astype(jnp.int32),
                        ((0, B_pad - B), (0, T_pad - T)))
    targets_p = targets_p.reshape(B_pad, T_pad, 1)

    # Per-chunk count of live time tiles (scalar-prefetched; clamped to >= 1
    # so the index_map clamp never goes negative).
    max_len_chunk = jnp.max(lens_flat.reshape(num_chunks, BB), axis=1)
    mt = jnp.clip((max_len_chunk + Tt - 1) // Tt, 1, num_t).astype(jnp.int32)

    # ---------------- VMEM budget from the real working set ----------------
    tile_elems = BB * Tt * Cp
    native_tile = tile_elems * itemsize
    f32_temps = 4 * tile_elems * 4          # upcast, exp, select result, slack
    vmem_limit = int(min(64 * 1024 * 1024,
                         max(32 * 1024 * 1024,
                             2 * native_tile + f32_temps + (4 << 20))))

    kernel = functools.partial(_seq_ce_loss_kernel, t_tile=Tt)
    out = pl.pallas_call(
        kernel,
        out_shape=jax.ShapeDtypeStruct((num_chunks, 8, 128), jnp.float32),
        grid_spec=pltpu.PrefetchScalarGridSpec(
            num_scalar_prefetch=1,
            grid=(num_chunks, num_t),
            in_specs=[
                # logits: un-padded in HBM; class block = full C (exempt from
                # the 128 rule); tail time tiles repeat the last live block
                # index so Pallas skips their DMA.
                pl.BlockSpec((BB, Tt, C),
                             lambda c, t, mt: (c, jnp.minimum(t, mt[c] - 1), 0)),
                pl.BlockSpec((BB, Tt, 1),
                             lambda c, t, mt: (c, jnp.minimum(t, mt[c] - 1), 0)),
                pl.BlockSpec((BB, 1, 1), lambda c, t, mt: (c, 0, 0)),   # clamped lengths
                pl.BlockSpec((BB, 1, 1), lambda c, t, mt: (c, 0, 0)),   # 1/(len*B) weights
            ],
            out_specs=pl.BlockSpec((1, 8, 128), lambda c, t, mt: (c, 0, 0)),
            scratch_shapes=[pltpu.VMEM((BB, 1, 1), jnp.float32)],
        ),
        compiler_params=pltpu.CompilerParams(
            # chunk axis parallel (2x on v7x megacore), time axis is the
            # carried reduction for the accumulator.
            dimension_semantics=("parallel", "arbitrary"),
            vmem_limit_bytes=vmem_limit,
        ),
    )(mt, model_output, targets_p, lens_p, w_p)

    # per-chunk partial sums -> scalar loss
    return jnp.sum(out[:, 0, 0])


def _reference_loss(model_output, groundtruth, lengths):
    """Pure-JAX reference mirroring the PyTorch loop."""
    B = model_output.shape[0]
    total = jnp.float32(0.0)
    for i in range(B):
        L = int(lengths[i])
        logits = model_output[i, :L].astype(jnp.float32)
        tgt = groundtruth[i, :L].astype(jnp.int32)
        lse = jax.scipy.special.logsumexp(logits, axis=-1)
        tgt_logit = jnp.take_along_axis(logits, tgt[:, None], axis=-1)[:, 0]
        total = total + jnp.mean(lse - tgt_logit)
    return total / B


if __name__ == "__main__":
    # Small shapes consistent with the module: batch=2, seq=8, num_classes=32.
    B, T, C = 2, 8, 32
    key = jax.random.PRNGKey(0)
    k_logits, k_tgt = jax.random.split(key)

    model_output = jax.random.normal(k_logits, (B, T, C), dtype=jnp.float32)
    groundtruth = jax.random.randint(k_tgt, (B, T), 0, C, dtype=jnp.int32)
    lengths = jnp.array([T, 5], dtype=jnp.int32)  # ragged valid lengths per sample

    loss = seq_cross_entropy_loss(model_output, groundtruth, lengths)
    jax.block_until_ready(loss)

    ref = _reference_loss(model_output, groundtruth, lengths)
    np.testing.assert_allclose(np.asarray(loss), np.asarray(ref), rtol=1e-5, atol=1e-5)

    print("KERNEL_OK")
</pallas_src>

<mosaic_0001>
module attributes {stable_mosaic.version = 11 : i64} {
  func.func @_seq_ce_loss_kernel(%arg0: i32, %arg1: i32, %arg2: memref<2xi32, #tpu.memory_space<smem>>, %arg3: memref<1x8x32xf32, #tpu.memory_space<vmem>>, %arg4: memref<1x8x1xi32, #tpu.memory_space<vmem>>, %arg5: memref<1x1x1xi32, #tpu.memory_space<vmem>>, %arg6: memref<1x1x1xf32, #tpu.memory_space<vmem>>, %arg7: memref<1x8x128xf32, #tpu.memory_space<vmem>>, %arg8: memref<1x1x1xf32, #tpu.memory_space<vmem>>) attributes {dimension_semantics = [#tpu.dimension_semantics<parallel>, #tpu.dimension_semantics<arbitrary>], iteration_bounds = array<i64: 2, 1>, scalar_prefetch = 1 : i64, scratch_operands = 1 : i64, tpu.core_type = #tpu.core_type<tc>, window_params = [{transform_indices = @transform_0, window_bounds = array<i64: 1, 8, 32>}, {transform_indices = @transform_1, window_bounds = array<i64: 1, 8, 1>}, {transform_indices = @transform_2, window_bounds = array<i64: 1, 1, 1>}, {transform_indices = @transform_3, window_bounds = array<i64: 1, 1, 1>}, {transform_indices = @transform_4, window_bounds = array<i64: 1, 8, 128>}]} {
    %c0_i32 = arith.constant 0 : i32
    %0 = arith.cmpi eq, %arg1, %c0_i32 : i32
    %1 = arith.extui %0 : i1 to i32
    %c0_i32_0 = arith.constant 0 : i32
    %2 = arith.cmpi ne, %1, %c0_i32_0 : i32
    scf.if %2 {
      %cst = arith.constant 0.000000e+00 : f32
      %11 = vector.broadcast %cst : f32 to vector<1x1x1xf32>
      %c0 = arith.constant 0 : index
      %c0_4 = arith.constant 0 : index
      %c0_5 = arith.constant 0 : index
      %12 = vector.load %arg8[%c0, %c0_4, %c0_5] : memref<1x1x1xf32, #tpu.memory_space<vmem>>, vector<1x1x1xf32>
      tpu.vector_store %arg8[%c0, %c0_4, %c0_5], %11 {strides = array<i32>} : memref<1x1x1xf32, #tpu.memory_space<vmem>>, vector<1x1x1xf32>,
    } else {
    }
    %3 = arith.index_cast %arg0 : i32 to index
    %4 = memref.load %arg2[%3] : memref<2xi32, #tpu.memory_space<smem>>
    %5 = arith.cmpi slt, %arg1, %4 : i32
    %6 = arith.extui %5 : i1 to i32
    %c0_i32_1 = arith.constant 0 : i32
    %7 = arith.cmpi ne, %6, %c0_i32_1 : i32
    scf.if %7 {
      %c0 = arith.constant 0 : index
      %c0_4 = arith.constant 0 : index
      %c0_5 = arith.constant 0 : index
      %11 = vector.load %arg3[%c0, %c0_4, %c0_5] : memref<1x8x32xf32, #tpu.memory_space<vmem>>, vector<1x8x32xf32>
      %c0_6 = arith.constant 0 : index
      %c0_7 = arith.constant 0 : index
      %c0_8 = arith.constant 0 : index
      %12 = vector.load %arg4[%c0_6, %c0_7, %c0_8] : memref<1x8x1xi32, #tpu.memory_space<vmem>>, vector<1x8x1xi32>
      %c0_9 = arith.constant 0 : index
      %c0_10 = arith.constant 0 : index
      %c0_11 = arith.constant 0 : index
      %13 = vector.load %arg5[%c0_9, %c0_10, %c0_11] : memref<1x1x1xi32, #tpu.memory_space<vmem>>, vector<1x1x1xi32>
      %cst = arith.constant dense<0xFF800000> : vector<1x8xf32>
      %14 = vector.multi_reduction <maximumf>, %11, %cst [2] : vector<1x8x32xf32> to vector<1x8xf32>
      %15 = vector.shape_cast %14 : vector<1x8xf32> to vector<1x8x1xf32>
      %16 = tpu.iota {dimensions = array<i32: 2>} : vector<1x1x32xi32>
      %17 = vector.broadcast %16 : vector<1x1x32xi32> to vector<1x8x32xi32>
      %18 = vector.broadcast %12 : vector<1x8x1xi32> to vector<1x8x32xi32>
      %19 = arith.cmpi eq, %17, %18 : vector<1x8x32xi32>
      %cst_12 = arith.constant 0.000000e+00 : f32
      %20 = vector.broadcast %cst_12 : f32 to vector<1x8x32xf32>
      %21 = arith.select %19, %11, %20 : vector<1x8x32xi1>, vector<1x8x32xf32>
      %cst_13 = arith.constant dense<0.000000e+00> : vector<1x8xf32>
      %22 = vector.multi_reduction <add>, %21, %cst_13 [2] : vector<1x8x32xf32> to vector<1x8xf32>
      %23 = vector.shape_cast %22 : vector<1x8xf32> to vector<1x8x1xf32>
      %24 = vector.broadcast %15 : vector<1x8x1xf32> to vector<1x8x32xf32>
      %25 = arith.subf %11, %24 : vector<1x8x32xf32>
      %26 = math.exp %25 : vector<1x8x32xf32>
      %cst_14 = arith.constant dense<0.000000e+00> : vector<1x8xf32>
      %27 = vector.multi_reduction <add>, %26, %cst_14 [2] : vector<1x8x32xf32> to vector<1x8xf32>
      %28 = vector.shape_cast %27 : vector<1x8xf32> to vector<1x8x1xf32>
      %29 = math.log %28 : vector<1x8x1xf32>
      %30 = arith.addf %15, %29 : vector<1x8x1xf32>
      %31 = arith.subf %30, %23 : vector<1x8x1xf32>
      %c8_i32 = arith.constant 8 : i32
      %32 = arith.muli %arg1, %c8_i32 : i32
      %33 = tpu.iota {dimensions = array<i32: 1>} : vector<1x8x1xi32>
      %34 = vector.broadcast %32 : i32 to vector<1x8x1xi32>
      %35 = arith.addi %34, %33 : vector<1x8x1xi32>
      %36 = vector.broadcast %13 : vector<1x1x1xi32> to vector<1x8x1xi32>
      %37 = arith.cmpi slt, %35, %36 : vector<1x8x1xi32>
      %cst_15 = arith.constant 0.000000e+00 : f32
      %38 = vector.broadcast %cst_15 : f32 to vector<1x8x1xf32>
      %39 = arith.select %37, %31, %38 : vector<1x8x1xi1>, vector<1x8x1xf32>
      %c0_16 = arith.constant 0 : index
      %c0_17 = arith.constant 0 : index
      %c0_18 = arith.constant 0 : index
      %40 = vector.load %arg8[%c0_16, %c0_17, %c0_18] : memref<1x1x1xf32, #tpu.memory_space<vmem>>, vector<1x1x1xf32>
      %cst_19 = arith.constant dense<0.000000e+00> : vector<1x1xf32>
      %41 = vector.multi_reduction <add>, %39, %cst_19 [1] : vector<1x8x1xf32> to vector<1x1xf32>
      %42 = vector.shape_cast %41 : vector<1x1xf32> to vector<1x1x1xf32>
      %43 = arith.addf %40, %42 : vector<1x1x1xf32>
      %c0_20 = arith.constant 0 : index
      %c0_21 = arith.constant 0 : index
      %c0_22 = arith.constant 0 : index
      %44 = vector.load %arg8[%c0_20, %c0_21, %c0_22] : memref<1x1x1xf32, #tpu.memory_space<vmem>>, vector<1x1x1xf32>
      tpu.vector_store %arg8[%c0_20, %c0_21, %c0_22], %43 {strides = array<i32>} : memref<1x1x1xf32, #tpu.memory_space<vmem>>, vector<1x1x1xf32>,
    } else {
    }
    %c0_i32_2 = arith.constant 0 : i32
    %8 = arith.cmpi eq, %arg1, %c0_i32_2 : i32
    %9 = arith.extui %8 : i1 to i32
    %c0_i32_3 = arith.constant 0 : i32
    %10 = arith.cmpi ne, %9, %c0_i32_3 : i32
    scf.if %10 {
      %c0 = arith.constant 0 : index
      %c0_4 = arith.constant 0 : index
      %c0_5 = arith.constant 0 : index
      %11 = vector.load %arg6[%c0, %c0_4, %c0_5] : memref<1x1x1xf32, #tpu.memory_space<vmem>>, vector<1x1x1xf32>
      %c0_6 = arith.constant 0 : index
      %c0_7 = arith.constant 0 : index
      %c0_8 = arith.constant 0 : index
      %12 = vector.load %arg8[%c0_6, %c0_7, %c0_8] : memref<1x1x1xf32, #tpu.memory_space<vmem>>, vector<1x1x1xf32>
      %13 = arith.mulf %12, %11 : vector<1x1x1xf32>
      %cst = arith.constant dense<0.000000e+00> : vector<1x1xf32>
      %14 = vector.multi_reduction <add>, %13, %cst [0] : vector<1x1x1xf32> to vector<1x1xf32>
      %15 = vector.shape_cast %14 : vector<1x1xf32> to vector<1x1x1xf32>
      %cst_9 = arith.constant 0.000000e+00 : f32
      %16 = vector.broadcast %cst_9 : f32 to vector<1x8x128xf32>
      %17 = vector.broadcast %15 : vector<1x1x1xf32> to vector<1x8x128xf32>
      %18 = arith.addf %16, %17 : vector<1x8x128xf32>
      %c0_10 = arith.constant 0 : index
      %c0_11 = arith.constant 0 : index
      %c0_12 = arith.constant 0 : index
      %19 = vector.load %arg7[%c0_10, %c0_11, %c0_12] : memref<1x8x128xf32, #tpu.memory_space<vmem>>, vector<1x8x128xf32>
      tpu.vector_store %arg7[%c0_10, %c0_11, %c0_12], %18 {strides = array<i32>} : memref<1x8x128xf32, #tpu.memory_space<vmem>>, vector<1x8x128xf32>,
    } else {
    }
    return
  }
  func.func @transform_0(%arg0: i32, %arg1: i32, %arg2: memref<2xi32, #tpu.memory_space<smem>>) -> (i32, i32, i32) {
    %0 = arith.index_cast %arg0 : i32 to index
    %1 = memref.load %arg2[%0] : memref<2xi32, #tpu.memory_space<smem>>
    %c1_i32 = arith.constant 1 : i32
    %2 = arith.subi %1, %c1_i32 : i32
    %3 = arith.minsi %arg1, %2 : i32
    %c0_i32 = arith.constant 0 : i32
    %c0_i32_0 = arith.constant 0 : i32
    return %arg0, %3, %c0_i32 : i32, i32, i32
  }
  func.func @transform_1(%arg0: i32, %arg1: i32, %arg2: memref<2xi32, #tpu.memory_space<smem>>) -> (i32, i32, i32) {
    %0 = arith.index_cast %arg0 : i32 to index
    %1 = memref.load %arg2[%0] : memref<2xi32, #tpu.memory_space<smem>>
    %c1_i32 = arith.constant 1 : i32
    %2 = arith.subi %1, %c1_i32 : i32
    %3 = arith.minsi %arg1, %2 : i32
    %c0_i32 = arith.constant 0 : i32
    %c0_i32_0 = arith.constant 0 : i32
    return %arg0, %3, %c0_i32 : i32, i32, i32
  }
  func.func @transform_2(%arg0: i32, %arg1: i32, %arg2: memref<2xi32, #tpu.memory_space<smem>>) -> (i32, i32, i32) {
    %c0_i32 = arith.constant 0 : i32
    %c0_i32_0 = arith.constant 0 : i32
    %c0_i32_1 = arith.constant 0 : i32
    return %arg0, %c0_i32, %c0_i32_0 : i32, i32, i32
  }
  func.func @transform_3(%arg0: i32, %arg1: i32, %arg2: memref<2xi32, #tpu.memory_space<smem>>) -> (i32, i32, i32) {
    %c0_i32 = arith.constant 0 : i32
    %c0_i32_0 = arith.constant 0 : i32
    %c0_i32_1 = arith.constant 0 : i32
    return %arg0, %c0_i32, %c0_i32_0 : i32, i32, i32
  }
  func.func @transform_4(%arg0: i32, %arg1: i32, %arg2: memref<2xi32, #tpu.memory_space<smem>>) -> (i32, i32, i32) {
    %c0_i32 = arith.constant 0 : i32
    %c0_i32_0 = arith.constant 0 : i32
    %c0_i32_1 = arith.constant 0 : i32
    return %arg0, %c0_i32, %c0_i32_0 : i32, i32, i32
  }
}

</mosaic_0001>

<bundles_post_ra>
// kernel: tpu_custom_call.1
= control target key start
LH: loop header
LB: loop body
LE: loop exit
PB: predicated region body
PF: predicated region fallthrough
CT: control target
= control target key end

     0   :  { %s721_s21 = smov [#allocation4]   ;;  %s899_s0 = inlined_call_operand.vmem [shape: s32[2], index: 0, kind: input, shape index: {}]   ;;  %s900_s1 = inlined_call_operand.vmem [shape: f32[2,8,32], index: 1, kind: input, shape index: {}]   ;;  %s901_s2 = inlined_call_operand.vmem [shape: s32[2,8,1], index: 2, kind: input, shape index: {}]   ;;  %s902_s3 = inlined_call_operand.vmem [shape: s32[2,1,1], index: 3, kind: input, shape index: {}]   ;;  %s903_s4 = inlined_call_operand.vmem [shape: f32[2,1,1], index: 4, kind: input, shape index: {}]   ;;  %s904_s5 = inlined_call_operand.hbm [shape: f32[2,8,128], index: 5, kind: output, shape index: {}]  }
   0x1   :  { %s11_s20 = sshll.u32 %s899_s0, 4  ;;  %s12_s20 = int_to_ptr.vmem [resolvable:$true] %s11_s20 }
   0x2   :  { %14 = dma.vmem_to_smem %s12_s20, 16, %s721_s21, [#allocation3] }
   0x3   :  { %691 = dma.done.wait [#allocation3], 16 }
   0x4   :  { %692 = vsyncadd [#allocation3], 4294967280 }
   0x5   :  { %17 = sfence }
   0x6   :  { %18 = vsyncpa [#allocation6], 0 }
   0x7   :  { %20 = vsyncpa [#allocation6 + $0x1], 0  ;;  %s758_s22 = smov 0   ;;  %s760_s23 = smov 0  }
   0x8   :  { %s762_s24 = smov 0   ;;  %s764_s25 = smov 0  }
   0x9   :  { %s766_s26 = smov 0   ;;  %s768_s27 = smov 0  }
   0xa LB: > { %s529_s0 = sadd.s32 4294967295, %s719_s27   ;;  %s530_s28 = sadd.s32 4294967294, %s719_s27   ;;  %s719_s27 = sphi %s768_s27, %s26_s27   ;;  %s715_s26 = sphi %s766_s26, %s918_s26   ;;  %s711_s25 = sphi %s764_s25, %s917_s25   ;;  %s707_s24 = sphi %s762_s24, %s916_s24   ;;  %s703_s23 = sphi %s760_s23, %s915_s23   ;;  %s699_s22 = sphi %s758_s22, %s914_s22  }
   0xb   : > { %s38_s29 = sadd.s32 1, %s715_s26  ;;  %s169_s30 = sadd.s32 1, %s707_s24 }
   0xc   : > { %p40_p0 = scmp.ge.s32.totalorder %s38_s29, 2  ;;  %p179_p1 = scmp.ne.s32.totalorder %s707_s24, %s703_s23 }
   0xd   : > { %p180_p2 = scmp.eq.s32.totalorder %s529_s0, 1  ;;  %p185_p3 = scmp.ne.s32.totalorder %s703_s23, %s699_s22 }
   0xe   : > { %s920_s29 = smov (%p40_p0, %s38_s29), 0  ;;  %p186_p5 = scmp.eq.s32.totalorder %s530_s28, 1 }
   0xf   : > { %907 = sst [smem:[#allocation9_spill]] %s920_s29  ;;  %p798_p4 = por %p180_p2, %p179_p1 }
  0x10   : > { %s166_s7 = ssub.s32 %s715_s26, %s920_s29  ;;  %p541_p6 = scmp.ge.s32.totalorder %s719_s27, 1 }
  0x11   : > { %p167_p7 = scmp.eq.s32.totalorder %s166_s7, 0  ;;  %p805_p8 = por %p186_p5, %p185_p3 }
  0x12   : > { %p252_p9 = scmp.lt.s32.totalorder %s719_s27, 3 }
  0x13   : > { %s811_s9 = scalar_select %p167_p7, %s707_s24, %s169_s30  }
  0x14   : > { %p253_p10 = pnand %p541_p6, %p252_p9 }
  0x15   : > { %s905_s10 = sand.u32 (!%p253_p10), 1, %s703_s23   ;;  %s301_s11 = sld [smem:[#allocation4 + %s711_s25]] (!%p253_p10) }
  0x16   : > { %256 = sbr.rel (%p253_p10) target bundleno = 446 (0x1be), region = 36  ;;  %s817_s12 = sshll.u32 (!%p253_p10), %s905_s10, 3 }
  0x17   : > { %p305_p11 = scmp.lt.s32.totalorder (!%p253_p10), %s711_s25, 1  ;;  %s316_s13 = sld [smem:[#allocation4 + %s711_s25]] (!%p253_p10) }
  0x18   : > { %s343_s15 = sld [smem:[#allocation4 + %s711_s25]] (!%p253_p10)  ;;  %s300_s29 = scalar_lea.vmem (!%p253_p10), [#allocation5], %s817_s12 }
  0x1b   : > { %vm341_vm0 = vcmask 0   ;;  %v722_v0 = vmov 0.0   ;;  %s823_s14 = scalar_select %p305_p11, %s711_s25, 1 }
  0x1c   : > { %342 = vst.msk [vmem:[#allocation2] sm:$0x1] %vm341_vm0, %v722_v0  ;;  %s543_s0 = sadd.s32 4294967295, %s301_s11 }
  0x1d   : > { %p544_p12 = scmp.gt.s32.totalorder %s543_s0, 0  ;;  %p546_p13 = scmp.lt.s32.totalorder %s543_s0, 0 }
  0x1e   : > { %s549_s28 = sadd.s32 4294967295, %s316_s13  ;;  %p556_p2 = scmp.le.s32.totalorder %s343_s15, 0 }
  0x1f   : > { %s922_s0 = smov (%p544_p12, %s543_s0), 0  ;;  %p550_p0 = scmp.gt.s32.totalorder %s549_s28, 0 }
  0x20   : > { %p552_p1 = scmp.lt.s32.totalorder %s549_s28, 0  ;;  %s924_s0 = smov (!%p546_p13, %s922_s0), 0 }
  0x21   : > { %s926_s28 = smov (%p550_p0, %s549_s28), 0  ;;  %s309_s30 = sadd.s32 %s924_s0, %s823_s14 }
  0x22   : > { %s548_s7 = sshll.u32 %s309_s30, 3  ;;  %s928_s28 = smov (!%p552_p1, %s926_s28), 0 }
  0x23   : > { %s311_s17 = scalar_lea.vmem %s900_s1, %s548_s7  ;;  %s324_s18 = sadd.s32 %s928_s28, %s823_s14 }
  0x24   : > { %s554_s19 = sshll.u32 %s324_s18, 3  ;;  %347 = sbr.rel (%p556_p2) target bundleno = 317 (0x13d), region = 44 }
  0x25   : > { %s326_s21 = scalar_lea.vmem %s901_s2, %s554_s19  ;;  %s910_s15 = scalar_lea.vmem (!%p556_p2), %s902_s3, %s823_s14 }
  0x29   : > { %v348_v1 = vld [vmem:[%s311_s17] sm:$0xff]  ;;  %vm351_vm1 = vcmask 261120   ;;  %v723_v3 = vmov 0   ;;  %v355_v10 = vlaneseq  ;;  %vm384_vm4 = vcmask 7168  }
  0x2a   : > { %v352_v2 = vsel %vm351_vm1, %v348_v1, -inf  ;;  %620 = vset.pattern.permute.xlu0 %v723_v3  ;;  %v349_v4 = vld [vmem:[%s326_s21] sm:$0xff] }
  0x2b   : > { %353 = vmax.xlane.f32.xlu0 %v352_v2  ;;  %v356_v11 = vand.u32 127, %v355_v10  ;;  %v377_v17 = vshrl.u32 %v355_v10, 7  ;;  %v621_v18 = vld [vmem:[%s910_s15] ss:$0 sm:$0xff] }
  0x2c   : > { %v383_v30 = vld [vmem:[#allocation2] sm:$0x1] }
  0x2d   : > { %vm381_vm3 = vcmp.lt.s32.totalorder %v377_v17, %v621_v18 }
  0x3f   : > { %358 = vperm.xlu0 %620, %v349_v4  }
  0x9e   : > { %v354_v5 = vpop.xlane.xlu0 %353 }
  0x9f   : > { %v365_v6 = vsub.f32 %v348_v1, %v354_v5 }
  0xa1   : > { %v366_v7 = vmul.f32 1.442695, %v365_v6 }
  0xa3   : > { %622 = vpow2.f32 %v366_v7 }
  0xa9   : > { %v623_v8 = vpop.eup %622 }
  0xaa   : > { %v368_v9 = vsel %vm351_vm1, %v623_v8, 0.0 }
  0xab   : > { %369 = vadd.xlane.f32.xlu1 %v368_v9 }
  0xb1   : > { %v359_v12 = vpop.permute.xlu0 %358 }
  0xb2   : > { %vm360_vm2 = vcmp.eq.s32.totalorder %v356_v11, %v359_v12 }
  0xb3   : > { %v361_v13 = vsel %vm360_vm2, %v348_v1, 0.0 }
  0xb4   : > { %v362_v14 = vsel %vm351_vm1, %v361_v13, 0.0 }
  0xb5   : > { %363 = vadd.xlane.f32.xlu1 %v362_v14 }
 0x11e   : > { %v370_v15 = vpop.xlane.xlu1 %369 }
 0x11f   : > { %624 = vlog2.f32 %v370_v15 }
 0x125   : > { %v625_v16 = vpop.eup %624 }
 0x126   : > { %v372_v19 = vmul.f32 0.6931472, %v625_v16 }
 0x128   : > { %v373_v20 = vadd.f32 %v372_v19, %v354_v5  ;;  %v364_v21 = vpop.xlane.xlu1 %363 }
 0x12a   : > { %v374_v22 = vsub.f32 %v373_v20, %v364_v21 }
 0x12c   : > { %v382_v23 = vsel %vm381_vm3, %v374_v22, 0.0 }
 0x12d   : > { %v385_v24 = vsel %vm384_vm4, %v382_v23, 0.0 }
 0x12e   : > { %v386_v25 = vrot.slane %v385_v24, 4 }
 0x130   : > { %v387_v26 = vadd.f32 %v386_v25, %v385_v24 }
 0x132   : > { %v388_v27 = vrot.slane %v387_v26, 2 }
 0x134   : > { %v389_v28 = vadd.f32 %v388_v27, %v387_v26 }
 0x136   : > { %v390_v29 = vrot.slane %v389_v28, 1 }
 0x138   : > { %v391_v31 = vadd.f32 %v390_v29, %v389_v28 }
 0x13a   : > { %v392_v32 = vadd.f32 %v391_v31, %v383_v30 }
 0x13c   : > { %394 = vst.msk [vmem:[#allocation2] sm:$0x1] %vm341_vm0, %v392_v32 }
 0x13d PF: > { %s911_s0 = scalar_lea.vmem %s903_s4, %s823_s14  ;;  %v724_v35 = vmov 0   ;;  %s558_s28 = sshll.u32 %s711_s25, 3 }
 0x13e   : > { %v398_v33 = vld [vmem:[%s911_s0] sm:$0x1]  ;;  %626 = vset.pattern.permute.xlu0 %v724_v35  ;;  %s421_s16 = scalar_lea.hbm %s904_s5, %s558_s28  ;;  %s423_s17 = sshll.u32 %s300_s29, 4  ;;  %s424_s17 = int_to_ptr.vmem [resolvable:$true] %s423_s17 }
 0x13f   : > { %s425_s14 = sshll.u32 %s421_s16, 4  ;;  %s912_s19 = sand.u32 1, %s703_s23   ;;  %s426_s14 = int_to_ptr.hbm [resolvable:$true] %s425_s14 }
 0x140   : > { %s411_s20 = scalar_lea.sflag [#allocation6], %s912_s19  ;;  %s653_s11 = sshra.s32 %s426_s14, 4  ;;  %s654_s11 = int_to_ptr.hbm [resolvable:$true] %s653_s11 }
 0x141   : > { %s655_s10 = scalar_lea.hbm %s654_s11, 8  ;;  %s659_s15 = scalar_lea.hbm %s904_s5, 16 }
 0x142   : > { %p656_p3 = scmp.ne.s32.totalorder %s654_s11, %s655_s10  ;;  %p660_p7 = scmp.lt.s32.totalorder %s654_s11, %s904_s5 }
 0x143   : > { %v399_v34 = vld [vmem:[#allocation2] sm:$0x1]  ;;  %p661_p9 = scmp.lt.s32.totalorder %s659_s15, %s655_s10 }
 0x144   : > { %v400_v36 = vmul.f32 %v399_v34, %v398_v33  ;;  %p657_p5 = pnand %p656_p3, %p798_p4 }
 0x145   : > { %p662_p10 = por %p661_p9, %p660_p7 }
 0x146   : > { %v403_v37 = vperm.slane %v400_v36, 0  ;;  %p658_p6 = pneg %p657_p5 }
 0x148   : > { %405 = vperm.xlu0 %626, %v403_v37   ;;  %p663_p11 = pnand %p662_p10, %p658_p6 }
 0x1ba   : > { %v406_v38 = vpop.permute.xlu0 %405 }
 0x1bb   : > { %409 = vst [vmem:[%s300_s29] sm:$0xff] %v406_v38 }
 0x1bc   : > { %666 = shalt.err (!%p663_p11)
}
 0x1bd   : > { %561 = dma.vmem_to_hbm [thread:$0]  (%p798_p4), %s424_s17, 128, %s426_s14, %s411_s20  }
 0x1be PF: > { %p567_p12 = scmp.ge.s32.totalorder %s719_s27, 2  ;;  %s437_s29 = sand.u32 1, %s699_s22  }
 0x1bf   : > { %s438_s12 = scalar_lea.sflag [#allocation6], %s437_s29 }
 0x1c0   : > { %p564_p13 = pnand %p567_p12, %p805_p8 }
 0x1c2   : > { %p565_p0 = pneg %p564_p13 }
 0x1c4   : > { %694 = dma.done.wait (%p565_p0), %s438_s12, 128  }
 0x1c5   : > { %696 = vsyncadd (%p565_p0), %s438_s12, 4294967168  ;;  %s26_s27 = sadd.s32 1, %s719_s27   ;;  %s913_s6 = sld [smem:[#allocation9_spill]] }
 0x1c6   : > { %p23_p1 = scmp.ge.s32.totalorder %s26_s27, 4   ;;  %s914_s22 = smov %s703_s23 }
 0x1c7   : > { %s915_s23 = smov %s707_s24  ;;  %s916_s24 = smov %s811_s9 }
 0x1c8   : > { %s917_s25 = smov %s715_s26  ;;  %25 = sbr.rel (!%p23_p1) target bundleno = 10 (0xa), region = 92 }
 0x1cb   : > { %s918_s26 = smov %s913_s6 }
 0x1cd   :  { %444 = vsyncpa [#allocation6], 1 }
 0x1ce   :  { %446 = vsyncpa [#allocation6 + $0x1], 1 }

</bundles_post_ra>
